<compile_context>
chip_gen: v7x
topology: tpu7x:2x2x1
jax: 0.10.0
libtpu: 0.0.40
codegen_flags: <defaults>
</compile_context>

<pallas_src>
import functools

import jax
import jax.numpy as jnp
from jax.experimental import pallas as pl
from jax.experimental.pallas import tpu as pltpu


def _spatial_weighting_kernel(x_ref, w1_ref, b1_ref, w2t_ref, b2_ref, o_ref,
                              *, inv_hw):
    # x_ref: (Bt, C, HW) slab covering Bt images.
    x = x_ref[...]                                               # native dtype

    # Global average pool per image: lane-axis reduce over HW, f32 accumulation,
    # mean folded into one multiply by the compile-time constant 1/HW.
    pooled = jnp.sum(x, axis=-1, dtype=jnp.float32) * inv_hw     # (Bt, C) f32

    # Squeeze: 1x1 conv C -> mid on the pooled vector, done on the VPU/XLU
    # (broadcast-multiply + lane reduce) rather than a degenerate MXU matmul.
    # w1_ref: (mid, C), lane-dense in C.
    h = jnp.sum(pooled[:, None, :] * w1_ref[...][None, :, :],
                axis=-1) + b1_ref[...]                           # (Bt, mid)
    h = jnp.maximum(h, 0.0)                                      # ReLU

    # Excite: 1x1 conv mid -> C. w2t_ref: (mid, C) (pre-transposed, lane-dense
    # in C); sublane reduce over mid.
    s = jnp.sum(h[:, :, None] * w2t_ref[...][None, :, :],
                axis=1) + b2_ref[...]                            # (Bt, C)
    s = jax.nn.sigmoid(s)                                        # Sigmoid, f32

    # Re-weight every spatial position. Multiply in f32, cast only at the store
    # (free when memory-bound; keeps sigmoid precision for bf16 inputs).
    o_ref[...] = (x.astype(jnp.float32) * s[:, :, None]).astype(o_ref.dtype)


def _largest_divisor_leq(n, cap):
    cap = max(1, min(n, int(cap)))
    for d in range(cap, 0, -1):
        if n % d == 0:
            return d
    return 1


def spatial_weighting(x_nchw, w1, b1, w2, b2, *, in_place=False):
    """SE-style spatial weighting.

    x_nchw: (B, C, H, W). w1: (mid, C), b1: (mid,), w2: (C, mid), b2: (C,).
    If in_place=True the output buffer aliases x (caller must not reuse x).
    """
    B, C, H, W = x_nchw.shape
    mid = w1.shape[0]
    HW = H * W

    # Free reshape (collapses trailing dims) -- no data movement, no transpose.
    x = x_nchw.reshape(B, C, HW)

    w1 = jnp.asarray(w1)                         # (mid, C)  lane-dense in C
    w2t = jnp.asarray(w2).T                      # (mid, C)  lane-dense in C
    b1r = jnp.asarray(b1).reshape(1, mid)        # row biases broadcast over Bt
    b2r = jnp.asarray(b2).reshape(1, C)

    # ---- Per-generation VMEM budget --------------------------------------
    # ~82% of physical VMEM: ~105 MiB on v5e/v6e (128 MiB), ~52 MiB on v7x
    # (64 MiB) -- leaves compiler scratch headroom on every generation.
    try:
        phys_vmem = int(pltpu.get_tpu_info().vmem_capacity_bytes)
    except Exception:
        phys_vmem = 64 << 20                      # conservative fallback
    vmem_budget = int(phys_vmem * 0.82)

    # Per-image VMEM cost: double-buffered input + double-buffered output plus
    # f32 temporaries (upcast of x / the x*s product before the store).
    itemsize = x.dtype.itemsize
    f32_temp_slabs = 1 if x.dtype == jnp.float32 else 2
    per_image = C * HW * (4 * itemsize + 4 * f32_temp_slabs)
    param_bytes = 2 * (2 * mid * C + mid + C) * 4
    overhead = param_bytes + (2 << 20)

    # ---- Pick Bt (images per grid step) -----------------------------------
    bt_vmem_cap = max(1, (vmem_budget - overhead) // per_image)
    # Keep >=2 grid steps so v7x's two TensorCores both get work (costs one
    # extra ~0.35 us step on single-TC chips -- negligible).
    bt_core_cap = max(1, B // 2) if B >= 2 else 1
    Bt = _largest_divisor_leq(B, min(bt_vmem_cap, bt_core_cap))

    if per_image + overhead > vmem_budget:
        # TODO(synk): add a grid=(B, 2, HW_tiles) two-phase variant (phase 0
        # accumulates the pooled (Bt, C) sum into persistent VMEM scratch,
        # phase 1 re-reads x tiles and applies the scale) for feature maps
        # whose single-image (C, HW) slab exceeds the per-generation budget.
        pass

    vmem_needed = Bt * per_image + overhead
    vmem_limit = int(min(vmem_budget, max(vmem_needed, 32 << 20)))

    kernel = functools.partial(_spatial_weighting_kernel, inv_hw=1.0 / HW)

    out = pl.pallas_call(
        kernel,
        out_shape=jax.ShapeDtypeStruct((B, C, HW), x.dtype),
        grid_spec=pltpu.PrefetchScalarGridSpec(
            num_scalar_prefetch=0,
            grid=(B // Bt,),
            in_specs=[
                pl.BlockSpec((Bt, C, HW), lambda i: (i, 0, 0)),   # x slab
                pl.BlockSpec((mid, C), lambda i: (0, 0)),         # w1
                pl.BlockSpec((1, mid), lambda i: (0, 0)),         # b1
                pl.BlockSpec((mid, C), lambda i: (0, 0)),         # w2^T
                pl.BlockSpec((1, C), lambda i: (0, 0)),           # b2
            ],
            out_specs=pl.BlockSpec((Bt, C, HW), lambda i: (i, 0, 0)),
        ),
        compiler_params=pltpu.CompilerParams(
            dimension_semantics=("parallel",),
            vmem_limit_bytes=vmem_limit,
        ),
        input_output_aliases=({0: 0} if in_place else {}),
    )(x, w1, b1r, w2t, b2r)

    # Free reshape back to NCHW.
    return out.reshape(B, C, H, W)


def _reference(x_nchw, w1, b1, w2, b2):
    pooled = jnp.mean(x_nchw, axis=(2, 3))                       # (B, C)
    h = jnp.maximum(pooled @ w1.T + b1, 0.0)                     # (B, mid)
    s = jax.nn.sigmoid(h @ w2.T + b2)                            # (B, C)
    return x_nchw * s[:, :, None, None]


if __name__ == "__main__":
    B, C, H, W = 2, 64, 16, 16
    ratio = 16
    mid = C // ratio                                             # 4

    key = jax.random.PRNGKey(0)
    kx, k1, k2, k3, k4 = jax.random.split(key, 5)

    x = jax.random.normal(kx, (B, C, H, W), dtype=jnp.float32)

    # Synthetic 1x1-conv parameters (conv1: C->mid, conv2: mid->C).
    w1 = jax.random.normal(k1, (mid, C), dtype=jnp.float32) * 0.1
    b1 = jax.random.normal(k2, (mid,), dtype=jnp.float32) * 0.1
    w2 = jax.random.normal(k3, (C, mid), dtype=jnp.float32) * 0.1
    b2 = jax.random.normal(k4, (C,), dtype=jnp.float32) * 0.1

    y = spatial_weighting(x, w1, b1, w2, b2)
    y = jax.block_until_ready(y)

    y_ref = _reference(x, w1, b1, w2, b2)
    assert y.shape == x.shape
    assert jnp.allclose(y, y_ref, atol=1e-5, rtol=1e-5), "mismatch vs reference"

    print("KERNEL_OK")
</pallas_src>

<mosaic_0001>
module attributes {stable_mosaic.version = 11 : i64} {
  func.func @_spatial_weighting_kernel(%arg0: i32, %arg1: memref<1x64x256xf32, #tpu.memory_space<vmem>>, %arg2: memref<4x64xf32, #tpu.memory_space<vmem>>, %arg3: memref<1x4xf32, #tpu.memory_space<vmem>>, %arg4: memref<4x64xf32, #tpu.memory_space<vmem>>, %arg5: memref<1x64xf32, #tpu.memory_space<vmem>>, %arg6: memref<1x64x256xf32, #tpu.memory_space<vmem>>) attributes {dimension_semantics = [#tpu.dimension_semantics<parallel>], iteration_bounds = array<i64: 2>, scalar_prefetch = 0 : i64, scratch_operands = 0 : i64, tpu.core_type = #tpu.core_type<tc>, window_params = [{transform_indices = @transform_0, window_bounds = array<i64: 1, 64, 256>}, {pipeline_mode = #tpu.pipeline_mode<synchronous>, transform_indices = @transform_1, window_bounds = array<i64: 4, 64>}, {pipeline_mode = #tpu.pipeline_mode<synchronous>, transform_indices = @transform_2, window_bounds = array<i64: 1, 4>}, {pipeline_mode = #tpu.pipeline_mode<synchronous>, transform_indices = @transform_3, window_bounds = array<i64: 4, 64>}, {pipeline_mode = #tpu.pipeline_mode<synchronous>, transform_indices = @transform_4, window_bounds = array<i64: 1, 64>}, {transform_indices = @transform_5, window_bounds = array<i64: 1, 64, 256>}]} {
    %c0 = arith.constant 0 : index
    %c0_0 = arith.constant 0 : index
    %c0_1 = arith.constant 0 : index
    %0 = vector.load %arg1[%c0, %c0_0, %c0_1] : memref<1x64x256xf32, #tpu.memory_space<vmem>>, vector<1x64x256xf32>
    %cst = arith.constant dense<0.000000e+00> : vector<1x64xf32>
    %1 = vector.multi_reduction <add>, %0, %cst [2] : vector<1x64x256xf32> to vector<1x64xf32>
    %cst_2 = arith.constant 3.906250e-03 : f32
    %2 = vector.broadcast %cst_2 : f32 to vector<1x64xf32>
    %3 = arith.mulf %1, %2 : vector<1x64xf32>
    %4 = vector.shape_cast %3 : vector<1x64xf32> to vector<1x1x64xf32>
    %c0_3 = arith.constant 0 : index
    %c0_4 = arith.constant 0 : index
    %5 = vector.load %arg2[%c0_3, %c0_4] : memref<4x64xf32, #tpu.memory_space<vmem>>, vector<4x64xf32>
    %6 = vector.shape_cast %5 : vector<4x64xf32> to vector<1x4x64xf32>
    %7 = vector.broadcast %4 : vector<1x1x64xf32> to vector<1x4x64xf32>
    %8 = arith.mulf %7, %6 : vector<1x4x64xf32>
    %cst_5 = arith.constant dense<0.000000e+00> : vector<1x4xf32>
    %9 = vector.multi_reduction <add>, %8, %cst_5 [2] : vector<1x4x64xf32> to vector<1x4xf32>
    %c0_6 = arith.constant 0 : index
    %c0_7 = arith.constant 0 : index
    %10 = vector.load %arg3[%c0_6, %c0_7] : memref<1x4xf32, #tpu.memory_space<vmem>>, vector<1x4xf32>
    %11 = arith.addf %9, %10 : vector<1x4xf32>
    %cst_8 = arith.constant 0.000000e+00 : f32
    %12 = vector.broadcast %cst_8 : f32 to vector<1x4xf32>
    %13 = arith.maximumf %11, %12 : vector<1x4xf32>
    %14 = vector.shape_cast %13 : vector<1x4xf32> to vector<1x4x1xf32>
    %c0_9 = arith.constant 0 : index
    %c0_10 = arith.constant 0 : index
    %15 = vector.load %arg4[%c0_9, %c0_10] : memref<4x64xf32, #tpu.memory_space<vmem>>, vector<4x64xf32>
    %16 = vector.shape_cast %15 : vector<4x64xf32> to vector<1x4x64xf32>
    %17 = vector.broadcast %14 : vector<1x4x1xf32> to vector<1x4x64xf32>
    %18 = arith.mulf %17, %16 : vector<1x4x64xf32>
    %cst_11 = arith.constant dense<0.000000e+00> : vector<1x64xf32>
    %19 = vector.multi_reduction <add>, %18, %cst_11 [1] : vector<1x4x64xf32> to vector<1x64xf32>
    %c0_12 = arith.constant 0 : index
    %c0_13 = arith.constant 0 : index
    %20 = vector.load %arg5[%c0_12, %c0_13] : memref<1x64xf32, #tpu.memory_space<vmem>>, vector<1x64xf32>
    %21 = arith.addf %19, %20 : vector<1x64xf32>
    %22 = arith.negf %21 : vector<1x64xf32>
    %23 = math.exp %22 : vector<1x64xf32>
    %cst_14 = arith.constant 1.000000e+00 : f32
    %24 = vector.broadcast %cst_14 : f32 to vector<1x64xf32>
    %25 = arith.addf %24, %23 : vector<1x64xf32>
    %26 = arith.divf %24, %25 : vector<1x64xf32>
    %27 = vector.shape_cast %26 : vector<1x64xf32> to vector<1x64x1xf32>
    %28 = vector.broadcast %27 : vector<1x64x1xf32> to vector<1x64x256xf32>
    %29 = arith.mulf %0, %28 : vector<1x64x256xf32>
    %c0_15 = arith.constant 0 : index
    %c0_16 = arith.constant 0 : index
    %c0_17 = arith.constant 0 : index
    %30 = vector.load %arg6[%c0_15, %c0_16, %c0_17] : memref<1x64x256xf32, #tpu.memory_space<vmem>>, vector<1x64x256xf32>
    tpu.vector_store %arg6[%c0_15, %c0_16, %c0_17], %29 {strides = array<i32>} : memref<1x64x256xf32, #tpu.memory_space<vmem>>, vector<1x64x256xf32>,
    return
  }
  func.func @transform_0(%arg0: i32) -> (i32, i32, i32) {
    %c0_i32 = arith.constant 0 : i32
    %c0_i32_0 = arith.constant 0 : i32
    %c0_i32_1 = arith.constant 0 : i32
    return %arg0, %c0_i32, %c0_i32_0 : i32, i32, i32
  }
  func.func @transform_1(%arg0: i32) -> (i32, i32) {
    %c0_i32 = arith.constant 0 : i32
    %c0_i32_0 = arith.constant 0 : i32
    %c0_i32_1 = arith.constant 0 : i32
    return %c0_i32, %c0_i32_0 : i32, i32
  }
  func.func @transform_2(%arg0: i32) -> (i32, i32) {
    %c0_i32 = arith.constant 0 : i32
    %c0_i32_0 = arith.constant 0 : i32
    %c0_i32_1 = arith.constant 0 : i32
    return %c0_i32, %c0_i32_0 : i32, i32
  }
  func.func @transform_3(%arg0: i32) -> (i32, i32) {
    %c0_i32 = arith.constant 0 : i32
    %c0_i32_0 = arith.constant 0 : i32
    %c0_i32_1 = arith.constant 0 : i32
    return %c0_i32, %c0_i32_0 : i32, i32
  }
  func.func @transform_4(%arg0: i32) -> (i32, i32) {
    %c0_i32 = arith.constant 0 : i32
    %c0_i32_0 = arith.constant 0 : i32
    %c0_i32_1 = arith.constant 0 : i32
    return %c0_i32, %c0_i32_0 : i32, i32
  }
  func.func @transform_5(%arg0: i32) -> (i32, i32, i32) {
    %c0_i32 = arith.constant 0 : i32
    %c0_i32_0 = arith.constant 0 : i32
    %c0_i32_1 = arith.constant 0 : i32
    return %arg0, %c0_i32, %c0_i32_0 : i32, i32, i32
  }
}

</mosaic_0001>

<bundles_post_ra>
// kernel: tpu_custom_call.1
= control target key start
LH: loop header
LB: loop body
LE: loop exit
PB: predicated region body
PF: predicated region fallthrough
CT: control target
= control target key end

     0   :  { %10 = vsyncpa [#allocation3], 0  ;;  %s1729_s0 = inlined_call_operand.hbm [shape: f32[2,64,256], index: 0, kind: input, shape index: {}]   ;;  %s1730_s1 = inlined_call_operand.hbm [shape: f32[4,64], index: 1, kind: input, shape index: {}]   ;;  %s1731_s2 = inlined_call_operand.vmem [shape: f32[1,4], index: 2, kind: input, shape index: {}]   ;;  %s1732_s3 = inlined_call_operand.vmem [shape: f32[4,64], index: 3, kind: input, shape index: {}]   ;;  %s1733_s4 = inlined_call_operand.vmem [shape: f32[1,64], index: 4, kind: input, shape index: {}]   ;;  %s1734_s5 = inlined_call_operand.hbm [shape: f32[2,64,256], index: 5, kind: output, shape index: {}]  }
   0x1   :  { %12 = vsyncpa [#allocation3 + $0x1], 0 }
   0x2   :  { %13 = vsyncpa [#allocation6], 0 }
   0x3   :  { %14 = vsyncpa [#allocation4], 0 }
   0x4   :  { %16 = vsyncpa [#allocation4 + $0x1], 0  ;;  %s1275_s18 = smov 0   ;;  %s1277_s19 = smov 0  }
   0x5   :  { %s1279_s20 = smov 0   ;;  %s1281_s21 = smov 0  }
   0x6 LB: > { %s1296_s22 = sadd.s32 4294967295, %s1235_s21   ;;  %s1019_s23 = sadd.s32 4294967294, %s1235_s21   ;;  %s1235_s21 = sphi %s1281_s21, %s1759_s21   ;;  %s1231_s20 = sphi %s1279_s20, %s1758_s20   ;;  %s1227_s19 = sphi %s1277_s19, %s1757_s19   ;;  %s1223_s18 = sphi %s1275_s18, %s1756_s18  }
   0x7   : > { %s1300_s24 = sadd.s32 1, %s1235_s21   ;;  %s29_s25 = sadd.s32 1, %s1231_s20 }
   0x8   : > { %s26_s26 = ssub.s32 %s1235_s21, %s1300_s24  ;;  %p36_p0 = scmp.ne.s32.totalorder %s1231_s20, %s1227_s19 }
   0x9   : > { %p27_p1 = scmp.eq.s32.totalorder %s26_s26, 0  ;;  %p37_p2 = scmp.eq.s32.totalorder %s1235_s21, 0 }
   0xa   : > { %p42_p3 = scmp.ne.s32.totalorder %s1227_s19, %s1223_s18  ;;  %p1735_p4 = scmp.eq.s32.totalorder %s1296_s22, 0 }
   0xb   : > { %s1312_s27 = scalar_select %p27_p1, %s1231_s20, %s29_s25  }
   0xc   : > { %p1314_p5 = por %p37_p2, %p36_p0  ;;  %p1320_p6 = por %p1735_p4, %p42_p3 }
   0xd   : > { %p150_p7 = scmp.eq.s32.totalorder %s1296_s22, 1  ;;  %p156_p8 = scmp.eq.s32.totalorder %s1019_s23, 1 }
   0xe   : > { %s1741_s29 = scalar_select %p1320_p6, 1, 0 }
   0xf   : > { %p1020_p9 = scmp.ge.s32.totalorder %s1235_s21, 1  ;;  %p163_p10 = scmp.lt.s32.totalorder %s1235_s21, 3 }
  0x10   : > { %p1327_p11 = por %p150_p7, %p36_p0  ;;  %p1331_p12 = por %p156_p8, %p42_p3 }
  0x11   : > { %p1335_p13 = pnand %p1020_p9, %p163_p10  ;;  %s1237_s8 = smov [#allocation5]  }
  0x12   : > { %s1742_s30 = scalar_select %p1327_p11, 1, 0 }
  0x13   : > { %s1743_s6 = scalar_select %p1331_p12, 1, 0 }
  0x14   : > { %s1744_s7 = scalar_select %p1335_p13, 1, 0 }
  0x15   : > { %p1047_p2 = pneg %p1335_p13  ;;  %s176_s9 = sshll.u32 %s1237_s8, 4  ;;  %s177_s9 = int_to_ptr.vmem [resolvable:$true] %s176_s9 }
  0x16   : > { %p1060_p4 = scmp.lt.s32.totalorder %s1235_s21, 2  ;;  %p1745_p0 = scmp.eq.s32.totalorder %s1296_s22, 0 }
  0x17   : > { %s196_s11 = sand.u32 1, %s1231_s20   ;;  %s1107_s16 = scalar_lea.hbm %s1730_s1, 64 }
  0x18   : > { %p1345_p7 = pnand %p1047_p2, %p1745_p0  ;;  %p1352_p3 = pnand %p1060_p4, %p1314_p5 }
  0x19   : > { %s1023_s13 = sshll.u32 %s196_s11, 7  ;;  %p1108_p8 = scmp.ne.s32.totalorder %s1730_s1, %s1107_s16 }
  0x1a   : > { %s1747_s12 = scalar_select %p1352_p3, 1, 0 }
  0x1b   : > { %p1109_p9 = pneg %p1345_p7  ;;  %p1114_p4 = scmp.lt.u32.totalorder %s1107_s16, %s1730_s1 }
  0x1d   : > { %p1110_p10 = pnand %p1109_p9, %p1108_p8 }
  0x1f   : > { %p1111_p2 = pneg %p1110_p10 }
  0x21   : > { %p1116_p5 = pnand %p1114_p4, %p1111_p2 }
  0x23   : > { %1119 = shalt.err (!%p1116_p5)
}
  0x24   : > { %s1120_s28 = scalar_lea.vmem %s177_s9, 64  ;;  %p1128_p11 = scmp.lt.s32.totalorder %s177_s9, %s177_s9 }
  0x25   : > { %p1121_p0 = scmp.ne.s32.totalorder %s177_s9, %s1120_s28  ;;  %p1129_p6 = scmp.lt.s32.totalorder %s1120_s28, %s1120_s28 }
  0x27   : > { %p1123_p1 = pnand %p1121_p0, %p1109_p9  ;;  %p1130_p13 = por %p1129_p6, %p1128_p11 }
  0x29   : > { %p1124_p12 = pneg %p1123_p1 }
  0x2b   : > { %p1131_p3 = pnand %p1130_p13, %p1124_p12 }
  0x2d   : > { %1134 = shalt.err (!%p1131_p3)
}
  0x2e   : > { %1050 = dma.hbm_to_vmem [thread:$0]  (!%p1345_p7), %s1730_s1, 64, %s177_s9, [#allocation6]  }
  0x2f   : > { %s1037_s15 = sshll.u32 %s1235_s21, 11  ;;  %s200_s16 = scalar_lea.vmem [#allocation2], %s1023_s13 }
  0x30   : > { %s207_s17 = sshll.u32 %s200_s16, 4  ;;  %s1376_s26 = scalar_lea.hbm %s1729_s0, %s1037_s15  ;;  %s1378_s17 = int_to_ptr.vmem [resolvable:$true] %s207_s17 }
  0x31   : > { %s1380_s10 = scalar_lea.sflag [#allocation3], %s196_s11  ;;  %s1135_s28 = scalar_lea.hbm %s1376_s26, 2048 }
  0x32   : > { %p1136_p6 = scmp.ne.s32.totalorder %s1376_s26, %s1135_s28  ;;  %p1748_p11 = scmp.ne.s32.totalorder %s1747_s12, 0 }
  0x33   : > { %s1140_s8 = scalar_lea.hbm %s1729_s0, 4096  ;;  %p1141_p7 = scmp.lt.u32.totalorder %s1376_s26, %s1729_s0 }
  0x34   : > { %p1137_p12 = pneg %p1748_p11  ;;  %p1142_p3 = scmp.lt.u32.totalorder %s1140_s8, %s1135_s28 }
  0x35   : > { %p1144_p9 = scmp.lt.u32.totalorder %s1135_s28, %s1376_s26 }
  0x36   : > { %p1138_p13 = pnand %p1137_p12, %p1136_p6  ;;  %p1143_p8 = por %p1142_p3, %p1141_p7 }
  0x38   : > { %p1139_p1 = pneg %p1138_p13  ;;  %p1145_p10 = por %p1144_p9, %p1143_p8 }
  0x3a   : > { %p1146_p2 = pnand %p1145_p10, %p1139_p1 }
  0x3c   : > { %1149 = shalt.err (!%p1146_p2)
}
  0x3d   : > { %s1150_s11 = scalar_lea.vmem %s1378_s17, 2048  ;;  %s1238_s16 = smov [#allocation2]  }
  0x3e   : > { %p1151_p4 = scmp.ne.s32.totalorder %s1378_s17, %s1150_s11  ;;  %s1155_s23 = sshll.u32 %s1238_s16, 4  ;;  %s1156_s23 = int_to_ptr.vmem [resolvable:$false] %s1155_s23 }
  0x3f   : > { %s1157_s25 = scalar_lea.vmem %s1156_s23, 4096  ;;  %p1158_p6 = scmp.lt.s32.totalorder %s1378_s17, %s1156_s23 }
  0x40   : > { %p1153_p5 = pnand %p1151_p4, %p1137_p12  ;;  %p1159_p13 = scmp.lt.s32.totalorder %s1157_s25, %s1150_s11 }
  0x42   : > { %p1154_p0 = pneg %p1153_p5  ;;  %p1160_p7 = por %p1159_p13, %p1158_p6 }
  0x44   : > { %p1161_p3 = pnand %p1160_p7, %p1154_p0 }
  0x46   : > { %1164 = shalt.err (!%p1161_p3)
}
  0x47   : > { %s1239_s28 = smov 256   ;;  %s1240_s9 = smov 16  }
  0x48   : > { %1054 = dma.hbm_to_vmem [thread:$0]  (!%p1748_p11), %s1376_s26, 2048, %s1378_s17, %s1380_s10, %s1239_s28, %s1239_s28, %s1240_s9  }
  0x49   : > { %p1749_p12 = scmp.ne.s32.totalorder %s1744_s7, 0 }
  0x4a   : > { %s1411_s13 = sand.u32 (!%p1749_p12), 1, %s1227_s19   ;;  %p1750_p1 = scmp.ne.s32.totalorder (!%p1749_p12), %s1741_s29, 0 }
  0x4b   : > { %219 = sbr.rel (%p1749_p12) target bundleno = 921 (0x399), region = 40  ;;  %s1027_s8 = sshll.u32 (!%p1749_p12), %s1411_s13, 7 }
  0x4c   : > { %s222_s14 = scalar_lea.sflag (!%p1749_p12), [#allocation3], %s1411_s13  ;;  %s225_s15 = scalar_lea.vmem (!%p1749_p12), [#allocation2], %s1027_s8 }
  0x52   : > { %1210 = dma.done.wait (%p1750_p1), %s222_s14, 2048  }
  0x53   : > { %1212 = vsyncadd (%p1750_p1), %s222_s14, 4294965248  ;;  %p1751_p11 = scmp.eq.s32.totalorder %s1296_s22, 0 }
  0x55   : > { %1214 = dma.done.wait (%p1751_p11), [#allocation6], 64   ;;  %p1752_p8 = pmov %p1751_p11 }
  0x56   : > { %v1425_v0 = vld [vmem:[%s225_s15 + $0x20] sm:$0xff]  ;;  %v1427_v1 = vld [vmem:[%s225_s15 + $0x28] sm:$0xff]  ;;  %v1435_v5 = vld [vmem:[%s225_s15 + $0x30] sm:$0xff]  ;;  %v306_v24 = vlaneseq  ;;  %v1241_v31 = vmov 0   ;;  %vm649_vm0 = vcmask 130112   ;;  %vm656_vm1 = vcmask 195712  }
  0x57   : > { %1216 = vsyncadd (%p1752_p8), [#allocation6], 4294967232  ;;  %v1429_v2 = vld [vmem:[%s225_s15] sm:$0xff]  ;;  %v278_v3 = vadd.f32 %v1427_v1, %v1425_v0  ;;  %v1433_v4 = vld [vmem:[%s225_s15 + $0x8] sm:$0xff]  ;;  %1102 = vset.pattern.permute.xlu1 %v1241_v31  ;;  %1101 = vset.pattern.permute.xlu0 %v1241_v31  ;;  %vm663_vm2 = vcmask 261312   ;;  %vm670_vm3 = vcmask 326912  }
  0x58   : > { %v1437_v6 = vld [vmem:[%s225_s15 + $0x38] sm:$0xff]  ;;  %v272_v7 = vadd.f32 %v1433_v4, %v1429_v2  ;;  %v1441_v8 = vld [vmem:[%s225_s15 + $0x10] sm:$0xff]  ;;  %v1453_v14 = vld [vmem:[%s225_s15 + $0x40] sm:$0xff]  ;;  %v1474_v25 = vshrl.u32 %v306_v24, 7  ;;  %vm677_vm4 = vcmask 392512   ;;  %vm684_vm5 = vcmask 458112  }
  0x59   : > { %v1443_v9 = vld [vmem:[%s225_s15 + $0x18] sm:$0xff]  ;;  %279 = vadd.xlane.f32.xlu1 %v278_v3  ;;  %v281_v10 = vadd.f32 %v1437_v6, %v1435_v5  ;;  %v1449_v12 = vld [vmem:[%s225_s15 + $0x50] sm:$0xff]  ;;  %v1455_v15 = vld [vmem:[%s225_s15 + $0x48] sm:$0xff]  ;;  %vm691_vm6 = vcmask 523712   ;;  %vm810_vm7 = vcmask 1041409   ;;  %vm812_vm8 = vcmask 1042434  }
  0x5a   : > { %273 = vadd.xlane.f32.xlu0 %v272_v7  ;;  %v275_v11 = vadd.f32 %v1443_v9, %v1441_v8  ;;  %v1451_v13 = vld [vmem:[%s225_s15 + $0x58] sm:$0xff]  ;;  %v284_v17 = vadd.f32 %v1455_v15, %v1453_v14  ;;  %v1461_v18 = vld [vmem:[%s225_s15 + $0x70] sm:$0xff]  ;;  %v1465_v20 = vld [vmem:[%s225_s15 + $0x60] sm:$0xff]  ;;  %v308_v26 = vsub.s32 0, %v1474_v25  ;;  %v343_v29 = vsub.s32 1, %v1474_v25  ;;  %s1648_s11 = scalar_lea.vmem [#allocation7], %s1027_s8 }
  0x5b   : > { %v287_v16 = vadd.f32 %v1451_v13, %v1449_v12  ;;  %v1463_v19 = vld [vmem:[%s225_s15 + $0x78] sm:$0xff]  ;;  %v1467_v21 = vld [vmem:[%s225_s15 + $0x68] sm:$0xff]  ;;  %v304_v27 = vld [vmem:[#allocation5] sm:$0xf]  ;;  %v378_v32 = vsub.s32 2, %v1474_v25  ;;  %v413_v34 = vsub.s32 3, %v1474_v25 }
  0x5c   : > { %v293_v22 = vadd.f32 %v1463_v19, %v1461_v18  ;;  %v290_v23 = vadd.f32 %v1467_v21, %v1465_v20  ;;  %v309_v28 = vrot.slane %v304_v27, %v308_v26  ;;  %v344_v30 = vrot.slane %v304_v27, %v343_v29  ;;  %s1038_s16 = sshll.u32 %s1296_s22, 11  ;;  %s936_s23 = sshll.u32 %s1648_s11, 4  ;;  %s1681_s23 = int_to_ptr.vmem [resolvable:$true] %s936_s23 }
  0x5d   : > { %282 = vadd.xlane.f32.xlu1 %v281_v10  ;;  %v379_v33 = vrot.slane %v304_v27, %v378_v32  ;;  %v414_v35 = vrot.slane %v304_v27, %v413_v34  ;;  %vm814_vm9 = vcmask 1043459   ;;  %vm817_vm10 = vcmask 519168   ;;  %s1679_s9 = scalar_lea.hbm %s1734_s5, %s1038_s16  ;;  %s923_s22 = scalar_lea.sflag [#allocation4], %s1411_s13 }
  0x5e   : > { %276 = vadd.xlane.f32.xlu0 %v275_v11  ;;  %s1165_s8 = scalar_lea.vmem %s1681_s23, 2048  ;;  %p1753_p10 = scmp.ne.s32.totalorder %s1742_s30, 0 }
  0x5f   : > { %p1166_p9 = scmp.ne.s32.totalorder %s1681_s23, %s1165_s8  ;;  %s1242_s14 = smov [#allocation7]  }
  0x60   : > { %s1169_s15 = sshll.u32 %s1242_s14, 4  ;;  %s1170_s15 = int_to_ptr.vmem [resolvable:$false] %s1169_s15 }
  0x61   : > { %288 = vadd.xlane.f32.xlu1 %v287_v16  ;;  %p1167_p2 = pnand %p1166_p9, %p1753_p10  ;;  %s1171_s29 = scalar_lea.vmem %s1170_s15, 4096 }
  0x62   : > { %285 = vadd.xlane.f32.xlu0 %v284_v17  ;;  %p1172_p5 = scmp.lt.s32.totalorder %s1681_s23, %s1170_s15  ;;  %p1173_p0 = scmp.lt.s32.totalorder %s1171_s29, %s1165_s8 }
  0x63   : > { %p1168_p4 = pneg %p1167_p2 }
  0x64   : > { %p1174_p6 = por %p1173_p0, %p1172_p5 }
  0x65   : > { %294 = vadd.xlane.f32.xlu1 %v293_v22 }
  0x66   : > { %291 = vadd.xlane.f32.xlu0 %v290_v23  ;;  %p1175_p13 = pnand %p1174_p6, %p1168_p4 }
  0x76   : > { %315 = vbcast.lane.b32.xlu1 %v309_v28, 264 }
  0x7a   : > { %346 = vbcast.lane.b32.xlu1 %v344_v30, 256 }
  0x7c   : > { %311 = vbcast.lane.b32.xlu0 %v309_v28, 256 }
  0x7e   : > { %350 = vbcast.lane.b32.xlu1 %v344_v30, 264 }
  0x80   : > { %319 = vbcast.lane.b32.xlu0 %v309_v28, 272 }
  0x82   : > { %354 = vbcast.lane.b32.xlu1 %v344_v30, 272 }
  0x84   : > { %381 = vbcast.lane.b32.xlu0 %v379_v33, 256 }
  0x86   : > { %385 = vbcast.lane.b32.xlu1 %v379_v33, 264 }
  0x88   : > { %323 = vbcast.lane.b32.xlu0 %v309_v28, 280 }
  0x8a   : > { %358 = vbcast.lane.b32.xlu1 %v344_v30, 280 }
  0x8c   : > { %389 = vbcast.lane.b32.xlu0 %v379_v33, 272 }
  0x8e   : > { %416 = vbcast.lane.b32.xlu1 %v414_v35, 256 }
  0x90   : > { %420 = vbcast.lane.b32.xlu0 %v414_v35, 264 }
  0x92   : > { %327 = vbcast.lane.b32.xlu1 %v309_v28, 288 }
  0x94   : > { %362 = vbcast.lane.b32.xlu0 %v344_v30, 288 }
  0x96   : > { %393 = vbcast.lane.b32.xlu1 %v379_v33, 280 }
  0x98   : > { %424 = vbcast.lane.b32.xlu0 %v414_v35, 272 }
  0x9a   : > { %331 = vbcast.lane.b32.xlu1 %v309_v28, 296 }
  0x9c   : > { %366 = vbcast.lane.b32.xlu0 %v344_v30, 296 }
  0x9e   : > { %397 = vbcast.lane.b32.xlu1 %v379_v33, 288 }
  0xa0   : > { %428 = vbcast.lane.b32.xlu0 %v414_v35, 280 }
  0xa2   : > { %335 = vbcast.lane.b32.xlu1 %v309_v28, 304 }
  0xa4   : > { %370 = vbcast.lane.b32.xlu0 %v344_v30, 304 }
  0xa6   : > { %401 = vbcast.lane.b32.xlu1 %v379_v33, 296 }
  0xa8   : > { %432 = vbcast.lane.b32.xlu0 %v414_v35, 288 }
  0xaa   : > { %339 = vbcast.lane.b32.xlu1 %v309_v28, 312 }
  0xac   : > { %374 = vbcast.lane.b32.xlu0 %v344_v30, 312 }
  0xae   : > { %405 = vbcast.lane.b32.xlu1 %v379_v33, 304 }
  0xb0   : > { %436 = vbcast.lane.b32.xlu0 %v414_v35, 296 }
  0xb2   : > { %409 = vbcast.lane.b32.xlu1 %v379_v33, 312 }
  0xb4   : > { %440 = vbcast.lane.b32.xlu0 %v414_v35, 304 }
  0xb6   : > { %444 = vbcast.lane.b32.xlu1 %v414_v35, 312 }
  0xe6   : > { %v280_v36 = vpop.xlane.xlu1 %279 }
  0xe7   : > { %v274_v37 = vpop.xlane.xlu0 %273  ;;  %v298_v53 = vmul.f32 0.00390625, %v280_v36 }
  0xe8   : > { %v296_v45 = vmul.f32 0.00390625, %v274_v37 }
  0xea   : > { %v283_v38 = vpop.xlane.xlu1 %282 }
  0xeb   : > { %v277_v39 = vpop.xlane.xlu0 %276  ;;  %v299_v62 = vmul.f32 0.00390625, %v283_v38 }
  0xec   : > { %v297_v44 = vmul.f32 0.00390625, %v277_v39 }
  0xee   : > { %v289_v40 = vpop.xlane.xlu1 %288 }
  0xef   : > { %v286_v41 = vpop.xlane.xlu0 %285  ;;  %v301_v39 = vmul.f32 0.00390625, %v289_v40 }
  0xf0   : > { %v300_v30 = vmul.f32 0.00390625, %v286_v41 }
  0xf2   : > { %v1482_v42 = vpop.xlane.xlu1 %294 }
  0xf3   : > { %v1484_v43 = vpop.xlane.xlu0 %291 }
  0xf6   : > { %v316_v46 = vpop.permute.xlu1 %315 }
  0xf7   : > { %v479_v47 = vmul.f32 %v316_v46, %v297_v44  ;;  %v312_v48 = vpop.permute.xlu0 %311 }
  0xf8   : > { %v478_v49 = vmul.f32 %v312_v48, %v296_v45 }
  0xf9   : > { %546 = vperm.xlu1 %1102, %v479_v47  }
  0xfa   : > { %543 = vperm.xlu0 %1101, %v478_v49   ;;  %v347_v50 = vpop.permute.xlu1 %346 }
  0xfb   : > { %v486_v51 = vmul.f32 %v347_v50, %v296_v45  ;;  %v320_v52 = vpop.permute.xlu0 %319 }
  0xfc   : > { %v480_v55 = vmul.f32 %v320_v52, %v298_v53 }
  0xfd   : > { %567 = vperm.xlu1 %1102, %v486_v51   ;;  %v302_v51 = vmul.f32 0.00390625, %v1484_v43 }
  0xfe   : > { %v351_v54 = vpop.permute.xlu1 %350 }
  0xff   : > { %v487_v56 = vmul.f32 %v351_v54, %v297_v44  ;;  %v382_v57 = vpop.permute.xlu0 %381 }
 0x100   : > { %v494_v59 = vmul.f32 %v382_v57, %v296_v45 }
 0x101   : > { %570 = vperm.xlu0 %1101, %v487_v56   ;;  %549 = vperm.xlu1 %1102, %v480_v55  }
 0x102   : > { %v355_v58 = vpop.permute.xlu1 %354 }
 0x103   : > { %v488_v60 = vmul.f32 %v355_v58, %v298_v53  ;;  %v324_v61 = vpop.permute.xlu0 %323 }
 0x104   : > { %v481_v3 = vmul.f32 %v324_v61, %v299_v62 }
 0x105   : > { %573 = vperm.xlu0 %1101, %v488_v60   ;;  %591 = vperm.xlu1 %1102, %v494_v59   ;;  %v303_v59 = vmul.f32 0.00390625, %v1482_v42 }
 0x106   : > { %v386_v63 = vpop.permute.xlu1 %385 }
 0x107   : > { %v495_v7 = vmul.f32 %v386_v63, %v297_v44  ;;  %v390_v10 = vpop.permute.xlu0 %389 }
 0x108   : > { %v496_v16 = vmul.f32 %v390_v10, %v298_v53 }
 0x109   : > { %594 = vperm.xlu0 %1101, %v495_v7   ;;  %552 = vperm.xlu1 %1102, %v481_v3  }
 0x10a   : > { %v359_v11 = vpop.permute.xlu1 %358 }
 0x10b   : > { %v489_v17 = vmul.f32 %v359_v11, %v299_v62  ;;  %v421_v22 = vpop.permute.xlu0 %420 }
 0x10c   : > { %v503_v27 = vmul.f32 %v421_v22, %v297_v44 }
 0x10d   : > { %576 = vperm.xlu0 %1101, %v489_v17   ;;  %597 = vperm.xlu1 %1102, %v496_v16  }
 0x10e   : > { %v417_v23 = vpop.permute.xlu1 %416 }
 0x10f   : > { %v502_v28 = vmul.f32 %v417_v23, %v296_v45  ;;  %v363_v29 = vpop.permute.xlu0 %362  ;;  %v1030_v23 = vld [vmem:[%s1731_s2] ss:$0 sm:$0xff] }
 0x110   : > { %v490_v32 = vmul.f32 %v363_v29, %v300_v30 }
 0x111   : > { %615 = vperm.xlu0 %1101, %v502_v28   ;;  %618 = vperm.xlu1 %1102, %v503_v27  }
 0x112   : > { %v328_v31 = vpop.permute.xlu1 %327 }
 0x113   : > { %v482_v33 = vmul.f32 %v328_v31, %v300_v30  ;;  %v425_v34 = vpop.permute.xlu0 %424 }
 0x114   : > { %v504_v36 = vmul.f32 %v425_v34, %v298_v53 }
 0x115   : > { %555 = vperm.xlu0 %1101, %v482_v33   ;;  %579 = vperm.xlu1 %1102, %v490_v32  }
 0x116   : > { %v394_v35 = vpop.permute.xlu1 %393 }
 0x117   : > { %v497_v37 = vmul.f32 %v394_v35, %v299_v62  ;;  %v367_v38 = vpop.permute.xlu0 %366 }
 0x118   : > { %v491_v44 = vmul.f32 %v367_v38, %v301_v39 }
 0x119   : > { %600 = vperm.xlu0 %1101, %v497_v37   ;;  %621 = vperm.xlu1 %1102, %v504_v36  }
 0x11a   : > { %v332_v46 = vpop.permute.xlu1 %331 }
 0x11b   : > { %v483_v45 = vmul.f32 %v332_v46, %v301_v39  ;;  %v429_v47 = vpop.permute.xlu0 %428 }
 0x11c   : > { %v505_v48 = vmul.f32 %v429_v47, %v299_v62 }
 0x11d   : > { %558 = vperm.xlu0 %1101, %v483_v45   ;;  %582 = vperm.xlu1 %1102, %v491_v44  }
 0x11e   : > { %v398_v41 = vpop.permute.xlu1 %397 }
 0x11f   : > { %v498_v49 = vmul.f32 %v398_v41, %v300_v30  ;;  %v371_v50 = vpop.permute.xlu0 %370 }
 0x120   : > { %v492_v53 = vmul.f32 %v371_v50, %v302_v51 }
 0x121   : > { %603 = vperm.xlu0 %1101, %v498_v49   ;;  %624 = vperm.xlu1 %1102, %v505_v48   ;;  %v639_v49 = vand.u32 127, %v306_v24 }
 0x122   : > { %v336_v52 = vpop.permute.xlu1 %335 }
 0x123   : > { %v484_v54 = vmul.f32 %v336_v52, %v302_v51  ;;  %v433_v40 = vpop.permute.xlu0 %432  ;;  %v644_v52 = vadd.s32 4294967288, %v639_v49  ;;  %v672_v24 = vadd.s32 4294967256, %v639_v49 }
 0x124   : > { %v506_v56 = vmul.f32 %v433_v40, %v300_v30 }
 0x125   : > { %561 = vperm.xlu0 %1101, %v484_v54   ;;  %585 = vperm.xlu1 %1102, %v492_v53   ;;  %v651_v53 = vadd.s32 4294967280, %v639_v49  ;;  %v658_v54 = vadd.s32 4294967272, %v639_v49 }
 0x126   : > { %v402_v55 = vpop.permute.xlu1 %401 }
 0x127   : > { %v499_v57 = vmul.f32 %v402_v55, %v301_v39  ;;  %v375_v58 = vpop.permute.xlu0 %374 }
 0x128   : > { %v493_v61 = vmul.f32 %v375_v58, %v303_v59  ;;  %v665_v58 = vadd.s32 4294967264, %v639_v49 }
 0x129   : > { %606 = vperm.xlu0 %1101, %v499_v57   ;;  %627 = vperm.xlu1 %1102, %v506_v56   ;;  %v647_v56 = vsub.s32 %v644_v52, %v1474_v25  ;;  %v642_v57 = vsub.s32 %v639_v49, %v1474_v25 }
 0x12a   : > { %v340_v60 = vpop.permute.xlu1 %339 }
 0x12b   : > { %v485_v62 = vmul.f32 %v340_v60, %v303_v59  ;;  %v437_v43 = vpop.permute.xlu0 %436  ;;  %v1540_v60 = vsub.s32 %v658_v54, %v1474_v25 }
 0x12c   : > { %v507_v3 = vmul.f32 %v437_v43, %v301_v39 }
 0x12d   : > { %564 = vperm.xlu0 %1101, %v485_v62   ;;  %588 = vperm.xlu1 %1102, %v493_v61   ;;  %v679_v61 = vadd.s32 4294967248, %v639_v49 }
 0x12e   : > { %v406_v63 = vpop.permute.xlu1 %405 }
 0x12f   : > { %v500_v7 = vmul.f32 %v406_v63, %v302_v51  ;;  %v441_v10 = vpop.permute.xlu0 %440  ;;  %v686_v63 = vadd.s32 4294967240, %v639_v49 }
 0x130   : > { %v508_v16 = vmul.f32 %v441_v10, %v302_v51  ;;  %v1548_v10 = vsub.s32 %v665_v58, %v1474_v25 }
 0x131   : > { %609 = vperm.xlu0 %1101, %v500_v7   ;;  %630 = vperm.xlu1 %1102, %v507_v3   ;;  %v1570_v49 = vsub.s32 %v686_v63, %v1474_v25 }
 0x132   : > { %v410_v11 = vpop.permute.xlu1 %409 }
 0x133   : > { %v501_v17 = vmul.f32 %v410_v11, %v303_v59 }
 0x135   : > { %612 = vperm.xlu0 %1101, %v501_v17   ;;  %633 = vperm.xlu1 %1102, %v508_v16  }
 0x136   : > { %v445_v42 = vpop.permute.xlu1 %444 }
 0x137   : > { %v509_v22 = vmul.f32 %v445_v42, %v303_v59  ;;  %v1537_v59 = vsub.s32 %v651_v53, %v1474_v25  ;;  %v1554_v42 = vsub.s32 %v672_v24, %v1474_v25 }
 0x139   : > { %636 = vperm.xlu0 %1101, %v509_v22  }
 0x13d   : > { %828 = vbcast.lane.b32.xlu0 %v1030_v23, 256 }
 0x178   : > { %v1491_v27 = vpop.permute.xlu1 %546 }
 0x179   : > { %v544_v28 = vpop.permute.xlu0 %543  ;;  %v648_v3 = vrot.slane %v1491_v27, %v647_v56 }
 0x17a   : > { %v643_v7 = vrot.slane %v544_v28, %v642_v57  ;;  %v1563_v28 = vsub.s32 %v679_v61, %v1474_v25 }
 0x17c   : > { %v1493_v29 = vpop.permute.xlu1 %567  ;;  %v650_v52 = vsel %vm649_vm0, %v648_v3, %v643_v7 }
 0x180   : > { %v1495_v30 = vpop.permute.xlu1 %549  ;;  %v1497_v31 = vpop.permute.xlu0 %570 }
 0x181   : > { %v655_v11 = vrot.slane %v1495_v30, %v1537_v59  ;;  %v700_v16 = vrot.slane %v1497_v31, %v647_v56  ;;  %v696_v30 = vrot.slane %v1493_v29, %v642_v57 }
 0x183   : > { %v701_v54 = vsel %vm649_vm0, %v700_v16, %v696_v30 }
 0x184   : > { %v1499_v32 = vpop.permute.xlu1 %591  ;;  %v1501_v33 = vpop.permute.xlu0 %573 }
 0x185   : > { %v705_v22 = vrot.slane %v1501_v33, %v1537_v59  ;;  %v735_v31 = vrot.slane %v1499_v32, %v642_v57  ;;  %v657_v32 = vsel %vm656_vm1, %v655_v11, %v650_v52 }
 0x187   : > { %v706_v24 = vsel %vm656_vm1, %v705_v22, %v701_v54 }
 0x188   : > { %v1503_v34 = vpop.permute.xlu1 %552  ;;  %v595_v35 = vpop.permute.xlu0 %594 }
 0x189   : > { %v739_v17 = vrot.slane %v595_v35, %v647_v56  ;;  %v662_v23 = vrot.slane %v1503_v34, %v1540_v60 }
 0x18b   : > { %v664_v61 = vsel %vm663_vm2, %v662_v23, %v657_v32 }
 0x18c   : > { %v1505_v36 = vpop.permute.xlu1 %597  ;;  %v1507_v37 = vpop.permute.xlu0 %576 }
 0x18d   : > { %v744_v27 = vrot.slane %v1505_v36, %v1537_v59  ;;  %v710_v35 = vrot.slane %v1507_v37, %v1540_v60  ;;  %v740_v37 = vsel %vm649_vm0, %v739_v17, %v735_v31 }
 0x190   : > { %v1509_v38 = vpop.permute.xlu1 %618  ;;  %v1511_v39 = vpop.permute.xlu0 %615 }
 0x191   : > { %v778_v36 = vrot.slane %v1509_v38, %v647_v56  ;;  %v774_v53 = vrot.slane %v1511_v39, %v642_v57  ;;  %v745_v38 = vsel %vm656_vm1, %v744_v27, %v740_v37  ;;  %v711_v39 = vsel %vm663_vm2, %v710_v35, %v706_v24 }
 0x193   : > { %v779_v3 = vsel %vm649_vm0, %v778_v36, %v774_v53 }
 0x194   : > { %v1513_v46 = vpop.permute.xlu1 %579  ;;  %v1515_v44 = vpop.permute.xlu0 %555 }
 0x195   : > { %v715_v29 = vrot.slane %v1513_v46, %v1548_v10  ;;  %v669_v58 = vrot.slane %v1515_v44, %v1548_v10 }
 0x197   : > { %v716_v7 = vsel %vm670_vm3, %v715_v29, %v711_v39 }
 0x198   : > { %v1517_v45 = vpop.permute.xlu1 %621  ;;  %v1519_v47 = vpop.permute.xlu0 %600 }
 0x199   : > { %v783_v46 = vrot.slane %v1517_v45, %v1537_v59  ;;  %v749_v56 = vrot.slane %v1519_v47, %v1540_v60  ;;  %v671_v45 = vsel %vm670_vm3, %v669_v58, %v664_v61 }
 0x19b   : > { %v784_v23 = vsel %vm656_vm1, %v783_v46, %v779_v3  ;;  %v750_v27 = vsel %vm663_vm2, %v749_v56, %v745_v38 }
 0x19c   : > { %v1521_v41 = vpop.permute.xlu1 %582  ;;  %v1523_v48 = vpop.permute.xlu0 %558 }
 0x19d   : > { %v720_v57 = vrot.slane %v1521_v41, %v1554_v42  ;;  %v676_v11 = vrot.slane %v1523_v48, %v1554_v42 }
 0x19f   : > { %v678_v31 = vsel %vm677_vm4, %v676_v11, %v671_v45 }
 0x1a0   : > { %v1526_v50 = vpop.permute.xlu1 %624  ;;  %v1528_v51 = vpop.permute.xlu0 %603 }
 0x1a1   : > { %v754_v16 = vrot.slane %v1528_v51, %v1548_v10  ;;  %v788_v17 = vrot.slane %v1526_v50, %v1540_v60 }
 0x1a3   : > { %v755_v50 = vsel %vm670_vm3, %v754_v16, %v750_v27 }
 0x1a4   : > { %v1530_v40 = vpop.permute.xlu1 %585  ;;  %v1532_v55 = vpop.permute.xlu0 %561 }
 0x1a5   : > { %v725_v47 = vrot.slane %v1530_v40, %v1563_v28  ;;  %v683_v41 = vrot.slane %v1532_v55, %v1563_v28  ;;  %v721_v40 = vsel %vm677_vm4, %v720_v57, %v716_v7 }
 0x1a8   : > { %v1542_v62 = vpop.permute.xlu1 %627  ;;  %v1544_v43 = vpop.permute.xlu0 %606 }
 0x1a9   : > { %v759_v59 = vrot.slane %v1544_v43, %v1554_v42  ;;  %v793_v55 = vrot.slane %v1542_v62, %v1548_v10  ;;  %v789_v62 = vsel %vm663_vm2, %v788_v17, %v784_v23  ;;  %v847_v17 = vld [vmem:[%s1733_s4] sm:$0x1] }
 0x1ab   : > { %v760_v52 = vsel %vm677_vm4, %v759_v59, %v755_v50 }
 0x1ac   : > { %v589_v33 = vpop.permute.xlu1 %588  ;;  %v565_v34 = vpop.permute.xlu0 %564 }
 0x1ad   : > { %v730_v22 = vrot.slane %v589_v33, %v1570_v49  ;;  %v690_v48 = vrot.slane %v565_v34, %v1570_v49  ;;  %v726_v33 = vsel %vm684_vm5, %v725_v47, %v721_v40  ;;  %v685_v34 = vsel %vm684_vm5, %v683_v41, %v678_v31 }
 0x1af   : > { %v731_v10 = vsel %vm691_vm6, %v730_v22, %v726_v33  ;;  %v692_v53 = vsel %vm691_vm6, %v690_v48, %v685_v34 }
 0x1b0   : > { %v631_v63 = vpop.permute.xlu1 %630  ;;  %v610_v44 = vpop.permute.xlu0 %609  ;;  %v811_v24 = vsel %vm810_vm7, %v731_v10, %v692_v53 }
 0x1b1   : > { %v764_v51 = vrot.slane %v610_v44, %v1563_v28  ;;  %v798_v60 = vrot.slane %v631_v63, %v1554_v42  ;;  %v794_v42 = vsel %vm670_vm3, %v793_v55, %v789_v62 }
 0x1b3   : > { %v765_v29 = vsel %vm684_vm5, %v764_v51, %v760_v52  ;;  %v799_v37 = vsel %vm677_vm4, %v798_v60, %v794_v42 }
 0x1b4   : > { %v634_v30 = vpop.permute.xlu1 %633  ;;  %v613_v43 = vpop.permute.xlu0 %612 }
 0x1b5   : > { %v769_v35 = vrot.slane %v613_v43, %v1570_v49  ;;  %v803_v36 = vrot.slane %v634_v30, %v1563_v28 }
 0x1b7   : > { %v770_v32 = vsel %vm691_vm6, %v769_v35, %v765_v29  ;;  %v804_v28 = vsel %vm684_vm5, %v803_v36, %v799_v37 }
 0x1b8   : > { %v637_v54 = vpop.permute.xlu0 %636  ;;  %v813_v38 = vsel %vm812_vm8, %v770_v32, %v811_v24 }
 0x1b9   : > { %v808_v58 = vrot.slane %v637_v54, %v1570_v49  ;;  %v833_v49 = vld [vmem:[%s1732_s3] sm:$0xf] }
 0x1bb   : > { %v809_v61 = vsel %vm691_vm6, %v808_v58, %v804_v28 }
 0x1bc   : > { %v815_v39 = vsel %vm814_vm9, %v809_v61, %v813_v38  ;;  %v829_v56 = vpop.permute.xlu0 %828 }
 0x1bd   : > { %v818_v46 = vsel %vm817_vm10, %v815_v39, 0.0 }
 0x1be   : > { %819 = vadd.xlane.f32.xlu1 %v818_v46 }
 0x24b   : > { %v820_v57 = vpop.xlane.xlu1 %819 }
 0x24c   : > { %v831_v63 = vadd.f32 %v829_v56, %v820_v57 }
 0x24e   : > { %v832_v44 = vmax.f32 %v831_v63, 0.0 }
 0x250   : > { %836 = vperm.xlu0 %1101, %v832_v44  }
 0x2cf   : > { %v837_v3 = vpop.permute.xlu0 %836 }
 0x2d0   : > { %v839_v7 = vmul.f32 %v837_v3, %v833_v49 }
 0x2d2   : > { %v840_v11 = vsel %vm817_vm10, %v839_v7, 0.0 }
 0x2d3   : > { %v841_v16 = vrot.slane %v840_v11, 4 }
 0x2d5   : > { %v842_v45 = vadd.f32 %v841_v16, %v840_v11 }
 0x2d7   : > { %v843_v47 = vrot.slane %v842_v45, 2 }
 0x2d9   : > { %v844_v41 = vadd.f32 %v843_v47, %v842_v45 }
 0x2db   : > { %v845_v59 = vrot.slane %v844_v41, 1 }
 0x2dd   : > { %v846_v22 = vadd.f32 %v845_v59, %v844_v41 }
 0x2df   : > { %v848_v48 = vadd.f32 %v847_v17, %v846_v22 }
 0x2e1   : > { %v1031_v51 = vmul.f32 -1.442695, %v848_v48 }
 0x2e3   : > { %1103 = vpow2.f32 %v1031_v51 }
 0x2ed   : > { %v1104_v23 = vpop.eup %1103 }
 0x2ee   : > { %v852_v27 = vadd.f32 1.0, %v1104_v23 }
 0x2f0   : > { %1105 = vrcp.f32 %v852_v27 }
 0x2fa   : > { %v1106_v40 = vpop.eup %1105 }
 0x2fb   : > { %v858_v55 = vrot.slane %v1106_v40, %v308_v26 }
 0x2fd   : > { %888 = vbcast.lane.b32.xlu1 %v858_v55, 312  ;;  %860 = vbcast.lane.b32.xlu0 %v858_v55, 256 }
 0x301   : > { %864 = vbcast.lane.b32.xlu0 %v858_v55, 264 }
 0x305   : > { %868 = vbcast.lane.b32.xlu0 %v858_v55, 272 }
 0x309   : > { %872 = vbcast.lane.b32.xlu0 %v858_v55, 280 }
 0x30d   : > { %876 = vbcast.lane.b32.xlu0 %v858_v55, 288 }
 0x311   : > { %880 = vbcast.lane.b32.xlu0 %v858_v55, 296 }
 0x315   : > { %884 = vbcast.lane.b32.xlu0 %v858_v55, 304 }
 0x36f   : > { %v889_v30 = vpop.permute.xlu1 %888  ;;  %v861_v43 = vpop.permute.xlu0 %860 }
 0x370   : > { %v904_v31 = vmul.f32 %v889_v30, %v1461_v18  ;;  %v905_v50 = vmul.f32 %v889_v30, %v1463_v19  ;;  %v890_v60 = vmul.f32 %v861_v43, %v1429_v2  ;;  %v891_v25 = vmul.f32 %v861_v43, %v1433_v4 }
 0x372   : > { %920 = vst [vmem:[%s1648_s11 + $0x70] sm:$0xff] %v904_v31  ;;  %921 = vst [vmem:[%s1648_s11 + $0x78] sm:$0xff] %v905_v50 }
 0x373   : > { %906 = vst [vmem:[%s1648_s11] sm:$0xff] %v890_v60  ;;  %907 = vst [vmem:[%s1648_s11 + $0x8] sm:$0xff] %v891_v25  ;;  %v865_v2 = vpop.permute.xlu0 %864 }
 0x374   : > { %v892_v4 = vmul.f32 %v865_v2, %v1441_v8  ;;  %v893_v18 = vmul.f32 %v865_v2, %v1443_v9 }
 0x376   : > { %908 = vst [vmem:[%s1648_s11 + $0x10] sm:$0xff] %v892_v4  ;;  %909 = vst [vmem:[%s1648_s11 + $0x18] sm:$0xff] %v893_v18 }
 0x377   : > { %v869_v19 = vpop.permute.xlu0 %868 }
 0x378   : > { %v894_v26 = vmul.f32 %v869_v19, %v1425_v0  ;;  %v895_v35 = vmul.f32 %v869_v19, %v1427_v1 }
 0x37a   : > { %910 = vst [vmem:[%s1648_s11 + $0x20] sm:$0xff] %v894_v26  ;;  %911 = vst [vmem:[%s1648_s11 + $0x28] sm:$0xff] %v895_v35 }
 0x37b   : > { %v873_v33 = vpop.permute.xlu0 %872 }
 0x37c   : > { %v896_v8 = vmul.f32 %v873_v33, %v1435_v5  ;;  %v897_v9 = vmul.f32 %v873_v33, %v1437_v6 }
 0x37e   : > { %912 = vst [vmem:[%s1648_s11 + $0x30] sm:$0xff] %v896_v8  ;;  %913 = vst [vmem:[%s1648_s11 + $0x38] sm:$0xff] %v897_v9 }
 0x37f   : > { %v877_v34 = vpop.permute.xlu0 %876 }
 0x380   : > { %v898_v52 = vmul.f32 %v877_v34, %v1453_v14  ;;  %v899_v0 = vmul.f32 %v877_v34, %v1455_v15 }
 0x382   : > { %914 = vst [vmem:[%s1648_s11 + $0x40] sm:$0xff] %v898_v52  ;;  %915 = vst [vmem:[%s1648_s11 + $0x48] sm:$0xff] %v899_v0 }
 0x383   : > { %v881_v1 = vpop.permute.xlu0 %880 }
 0x384   : > { %v900_v36 = vmul.f32 %v881_v1, %v1449_v12  ;;  %v901_v5 = vmul.f32 %v881_v1, %v1451_v13 }
 0x386   : > { %916 = vst [vmem:[%s1648_s11 + $0x50] sm:$0xff] %v900_v36  ;;  %917 = vst [vmem:[%s1648_s11 + $0x58] sm:$0xff] %v901_v5 }
 0x387   : > { %v885_v6 = vpop.permute.xlu0 %884 }
 0x388   : > { %v902_v12 = vmul.f32 %v885_v6, %v1465_v20  ;;  %v903_v14 = vmul.f32 %v885_v6, %v1467_v21 }
 0x38a   : > { %918 = vst [vmem:[%s1648_s11 + $0x60] sm:$0xff] %v902_v12  ;;  %919 = vst [vmem:[%s1648_s11 + $0x68] sm:$0xff] %v903_v14 }
 0x38b   : > { %1178 = shalt.err (!%p1175_p13)
}
 0x38c   : > { %s1179_s7 = scalar_lea.hbm %s1679_s9, 2048  ;;  %s1183_s26 = scalar_lea.hbm %s1734_s5, 4096 }
 0x38d   : > { %p1180_p7 = scmp.ne.s32.totalorder %s1679_s9, %s1179_s7  ;;  %p1184_p1 = scmp.lt.u32.totalorder %s1679_s9, %s1734_s5 }
 0x38e   : > { %p1185_p11 = scmp.lt.u32.totalorder %s1183_s26, %s1179_s7  ;;  %p1187_p9 = scmp.lt.u32.totalorder %s1179_s7, %s1679_s9 }
 0x38f   : > { %p1181_p3 = pnand %p1180_p7, %p1753_p10 }
 0x390   : > { %p1186_p8 = por %p1185_p11, %p1184_p1 }
 0x391   : > { %p1182_p12 = pneg %p1181_p3 }
 0x392   : > { %p1188_p2 = por %p1187_p9, %p1186_p8 }
 0x394   : > { %p1189_p4 = pnand %p1188_p2, %p1182_p12 }
 0x396   : > { %1192 = shalt.err (!%p1189_p4)
}
 0x397   : > { %s1243_s16 = smov 256   ;;  %s1244_s25 = smov 16  }
 0x398   : > { %1045 = dma.vmem_to_hbm [thread:$0]  (%p1753_p10), %s1681_s23, 2048, %s1679_s9, %s923_s22, %s1243_s16, %s1243_s16, %s1244_s25  }
 0x399 PF: > { %s951_s28 = sand.u32 1, %s1223_s18   ;;  %p1754_p5 = scmp.ne.s32.totalorder %s1743_s6, 0 }
 0x39a   : > { %p1755_p0 = scmp.ge.s32.totalorder %s1235_s21, 2  ;;  %s952_s8 = scalar_lea.sflag [#allocation4], %s951_s28 }
 0x39c   : > { %p1056_p6 = pnand %p1755_p0, %p1754_p5 }
 0x39e   : > { %1218 = dma.done.wait (!%p1056_p6), %s952_s8, 2048  }
 0x39f   : > { %1220 = vsyncadd (!%p1056_p6), %s952_s8, 4294965248  ;;  %p19_p13 = scmp.ge.s32.totalorder %s1300_s24, 4   ;;  %s1756_s18 = smov %s1227_s19 }
 0x3a0   : > { %s1757_s19 = smov %s1231_s20  ;;  %s1758_s20 = smov %s1312_s27 }
 0x3a1   : > { %s1759_s21 = smov %s1300_s24  ;;  %21 = sbr.rel (!%p19_p13) target bundleno = 6 (0x6), region = 89 }
 0x3a8   :  { %957 = vsyncpa [#allocation3], 1 }
 0x3a9   :  { %959 = vsyncpa [#allocation3 + $0x1], 1 }
 0x3aa   :  { %960 = vsyncpa [#allocation6], 1 }
 0x3ab   :  { %961 = vsyncpa [#allocation4], 1 }
 0x3ac   :  { %963 = vsyncpa [#allocation4 + $0x1], 1 }

</bundles_post_ra>
